<compile_context>
chip_gen: v6e
topology: v6e:2x2x1
jax: 0.10.0
libtpu: 0.0.40
codegen_flags: <defaults>
</compile_context>

<pallas_src>
import functools

import numpy as np
import jax
import jax.numpy as jnp
from jax import lax
from jax.experimental import pallas as pl
from jax.experimental.pallas import tpu as pltpu

_FUSED_HW_LIMIT_F32 = 256
_FUSED_HW_LIMIT_BF16 = 512


# ---------------------------------------------------------------------------
# Static index / plan helpers (numpy, lru_cached -> compile-time constants).
# ---------------------------------------------------------------------------
def _round_up(x, m):
    return ((x + m - 1) // m) * m


def _sel_dtype(x_dtype):
    return jnp.bfloat16 if x_dtype == jnp.bfloat16 else jnp.float32


def _src_index(size, down_scale):
    """Composite source index of nearest down(size->dsize) then up(dsize->size)."""
    dsize = max(1, int(down_scale * size))       # matches int(s * shape) in torch
    i = np.arange(size, dtype=np.int64)
    up_idx = (i * dsize) // size                 # nearest src in the downsampled image
    return (up_idx * size) // dsize              # nearest src in the original image


def _vmem_limit(needed_bytes):
    """Clamp the VMEM request under this generation's physical capacity."""
    try:
        cap = int(pltpu.get_tpu_info().vmem_capacity_bytes)
    except Exception:                            # no info available -> assume v7x (smallest)
        cap = 64 * 2**20
    cap = max(32 * 2**20, cap - 8 * 2**20)       # leave compiler-scratch headroom
    return int(min(cap, max(32 * 2**20, int(needed_bytes))))


def _invariant_spec(shape, index_map):
    """BlockSpec for a grid-invariant operand: single-buffer it when supported."""
    if hasattr(pl, "Buffered"):
        try:
            return pl.BlockSpec(shape, index_map, pipeline_mode=pl.Buffered(1))
        except Exception:
            pass
    return pl.BlockSpec(shape, index_map)


@functools.lru_cache(maxsize=32)
def _fused_gather_matrix_np(H, W, HWp, down_scale):
    """(HWp, HWp) one-hot G with (x2 @ G)[r, q] = x2[r, src_flat[q]]."""
    ri = _src_index(H, down_scale)
    ci = _src_index(W, down_scale)
    src = (ri[:, None] * W + ci[None, :]).reshape(-1)          # (H*W,)
    g = np.zeros((HWp, HWp), dtype=np.float32)
    g[src, np.arange(H * W)] = 1.0
    return g


@functools.lru_cache(maxsize=32)
def _tiled_plan(B, H, W, down_scale, itemsize):
    """Pick (Wp, TB, TH, TW) and build the per-tile one-hot selection matrices.

    TH / TW are block-aligned periods of the composite nearest index map, so
    the source tile of every output tile is the *same* tile and the per-tile
    selection matrices are identical for every grid step (verified below).
    """
    ri = _src_index(H, down_scale)
    ci = _src_index(W, down_scale)

    # Lane-dense output: pad W to a multiple of 128 (only when inflation < 2x).
    Wp = W if (W < 128 or W % 128 == 0) else _round_up(W, 128)
    if Wp > W:
        ci = np.concatenate([ci, np.arange(W, Wp, dtype=np.int64)])

    def periodic(idx, size, t):
        if size % t:
            return False
        base = np.tile(idx[:t], size // t) + np.repeat(
            np.arange(0, size, t, dtype=np.int64), t)
        return bool(np.array_equal(idx, base))

    def smallest_tile(idx, size, mult):
        for t in range(mult, size + 1, mult):
            if periodic(idx, size, t):
                return t
        return size                                             # fall back to full dim

    tw = smallest_tile(ci, Wp, 128)
    th = smallest_tile(ri, H, 8)
    base_th = th

    # Batch slabs per step: biggest divisor of B keeping the input block <= ~1 MiB.
    max_block = 1 << 20
    tb = 1
    for d in range(1, B + 1):
        if B % d == 0 and d * th * tw * itemsize <= max_block:
            tb = d
    if th % 8 != 0:            # th == H with H not a multiple of 8: keep reshapes trivial
        tb = 1

    # Grow the row tile until blocks are a reasonable DMA size (flops stay modest).
    if base_th < H and base_th % 8 == 0:
        for cand in range(base_th, min(H, 512) + 1, base_th):
            if H % cand:
                continue
            if tb * cand * tw * itemsize > max_block:
                break
            th = cand
            if tb * th * tw * itemsize >= (256 << 10):
                break

    s_h = np.zeros((th, th), dtype=np.float32)
    s_h[np.arange(th), ri[:th]] = 1.0            # rows = s_h @ x   (out h <- src ri[h])
    s_wt = np.zeros((tw, tw), dtype=np.float32)
    s_wt[ci[:tw], np.arange(tw)] = 1.0           # cols = x @ s_wt  (out w <- src ci[w])
    return Wp, tb, th, tw, s_h, s_wt


# ---------------------------------------------------------------------------
# Small-image path: fused (HW, HW) one-hot gather matmul.
# ---------------------------------------------------------------------------
def _resize_fused_kernel(g_ref, x_ref, o_ref):
    x = x_ref[...].astype(g_ref.dtype)           # no-op when dtypes already match
    y = jnp.dot(x, g_ref[...], preferred_element_type=jnp.float32)
    o_ref[...] = y.astype(o_ref.dtype)


def _resize_fused(image, down_scale):
    N, C, H, W = image.shape
    B, HW = N * C, H * W
    HWp = max(128, _round_up(HW, 128))
    dt = _sel_dtype(image.dtype)
    isz = jnp.dtype(image.dtype).itemsize
    sel_isz = jnp.dtype(dt).itemsize

    gmat = jnp.asarray(_fused_gather_matrix_np(H, W, HWp, float(down_scale)), dtype=dt)

    # Several grid steps for big batches; padding wastes at most one block.
    tb = min(256, max(8, _round_up(-(-B // 8), 8)))
    Bp = _round_up(B, tb)

    x2 = image.reshape(B, HW)
    if Bp > B or HWp > HW:
        x2 = jnp.pad(x2, ((0, Bp - B), (0, HWp - HW)))

    needed = HWp * HWp * sel_isz + 4 * tb * HWp * isz + (2 << 20)
    cost = pl.CostEstimate(
        flops=2 * Bp * HWp * HWp,
        transcendentals=0,
        bytes_accessed=2 * Bp * HWp * isz + HWp * HWp * sel_isz)

    out2 = pl.pallas_call(
        _resize_fused_kernel,
        out_shape=jax.ShapeDtypeStruct((Bp, HWp), image.dtype),
        grid_spec=pltpu.PrefetchScalarGridSpec(
            num_scalar_prefetch=0,
            grid=(Bp // tb,),
            in_specs=[
                _invariant_spec((HWp, HWp), lambda i: (0, 0)),   # resident gather matrix
                pl.BlockSpec((tb, HWp), lambda i: (i, 0)),
            ],
            out_specs=pl.BlockSpec((tb, HWp), lambda i: (i, 0)),
        ),
        compiler_params=pltpu.CompilerParams(
            dimension_semantics=("parallel",),
            vmem_limit_bytes=_vmem_limit(needed)),
        cost_estimate=cost,
    )(gmat, x2)

    return out2[:B, :HW].reshape(N, C, H, W)


# ---------------------------------------------------------------------------
# General path: period-aligned (TB, TH, TW) tiles, small separable matmuls.
# ---------------------------------------------------------------------------
def _resize_tiled_kernel(sh_ref, swt_ref, x_ref, o_ref):
    tb, th, tw = x_ref.shape
    x = x_ref[...].astype(swt_ref.dtype)                         # (TB, TH, TW)
    # Column gather: one lane-dense 2D matmul over all TB*TH rows.
    cols = jnp.dot(x.reshape(tb * th, tw), swt_ref[...],
                   preferred_element_type=jnp.float32)
    cols = cols.reshape(tb, th, tw).astype(sh_ref.dtype)         # exact (one-hot values)
    # Row gather: small batched matmul, no transposes / cross-lane work.
    sh = jnp.broadcast_to(sh_ref[...], (tb, th, th))
    out = lax.dot_general(sh, cols,
                          dimension_numbers=(((2,), (1,)), ((0,), (0,))),
                          preferred_element_type=jnp.float32)    # (TB, TH, TW)
    o_ref[...] = out.astype(o_ref.dtype)


def _resize_tiled(image, down_scale):
    N, C, H, W = image.shape
    B = N * C
    dt = _sel_dtype(image.dtype)
    isz = jnp.dtype(image.dtype).itemsize
    sel_isz = jnp.dtype(dt).itemsize

    Wp, tb, th, tw, s_h_np, s_wt_np = _tiled_plan(B, H, W, float(down_scale), isz)
    s_h = jnp.asarray(s_h_np, dtype=dt)
    s_wt = jnp.asarray(s_wt_np, dtype=dt)

    x3 = image.reshape(B, H, W)
    if Wp > W:
        x3 = jnp.pad(x3, ((0, 0), (0, 0), (0, Wp - W)))

    block_bytes = tb * th * tw * isz
    needed = ((th * th + tw * tw) * sel_isz      # single-buffered selection matrices
              + 4 * block_bytes                  # double-buffered input + output blocks
              + tb * th * tw * 4                 # f32 intermediate between the two dots
              + (2 << 20))                       # compiler scratch headroom
    cost = pl.CostEstimate(
        flops=2 * B * H * Wp * (th + tw),
        transcendentals=0,
        bytes_accessed=2 * B * H * Wp * isz + (th * th + tw * tw) * sel_isz)

    out3 = pl.pallas_call(
        _resize_tiled_kernel,
        out_shape=jax.ShapeDtypeStruct((B, H, Wp), image.dtype),
        grid_spec=pltpu.PrefetchScalarGridSpec(
            num_scalar_prefetch=0,
            grid=(B // tb, H // th, Wp // tw),
            in_specs=[
                _invariant_spec((th, th), lambda b, i, j: (0, 0)),
                _invariant_spec((tw, tw), lambda b, i, j: (0, 0)),
                pl.BlockSpec((tb, th, tw), lambda b, i, j: (b, i, j)),
            ],
            out_specs=pl.BlockSpec((tb, th, tw), lambda b, i, j: (b, i, j)),
        ),
        compiler_params=pltpu.CompilerParams(
            dimension_semantics=("parallel", "parallel", "parallel"),
            vmem_limit_bytes=_vmem_limit(needed)),
        cost_estimate=cost,
    )(s_h, s_wt, x3)

    return out3[:, :, :W].reshape(N, C, H, W)


# ---------------------------------------------------------------------------
# Public entry point (equivalent of Resize()([image, ...]) -> noised image).
# ---------------------------------------------------------------------------
def resize_forward(image, down_scale=0.5):
    N, C, H, W = image.shape
    hw = H * W
    limit = _FUSED_HW_LIMIT_BF16 if image.dtype == jnp.bfloat16 else _FUSED_HW_LIMIT_F32
    if hw <= limit:
        return _resize_fused(image, down_scale)
    return _resize_tiled(image, down_scale)


class Resize:
    """Drop-in analogue of the PyTorch module: __call__([image, ...]) -> noised."""

    def __init__(self, down_scale=0.5):
        self.down_scale = down_scale

    def __call__(self, image_cover_mask):
        return resize_forward(image_cover_mask[0], self.down_scale)


def resize_reference(image, down_scale=0.5):
    """Pure-JAX reference matching F.interpolate(mode='nearest') twice."""
    ri = jnp.asarray(_src_index(image.shape[2], down_scale))
    ci = jnp.asarray(_src_index(image.shape[3], down_scale))
    return image[:, :, ri, :][:, :, :, ci]


if __name__ == "__main__":
    key = jax.random.PRNGKey(0)
    x = jax.random.normal(key, (2, 4, 16, 16), dtype=jnp.float32)

    ref = resize_reference(x, 0.5)
    out = jax.block_until_ready(resize_forward(x, down_scale=0.5))
    assert out.shape == x.shape and out.dtype == x.dtype
    assert jnp.allclose(out, ref, atol=1e-6, rtol=1e-6)

    # Force the separable tiled path on the same small input.
    out_t = jax.block_until_ready(_resize_tiled(x, 0.5))
    assert jnp.allclose(out_t, ref, atol=1e-6, rtol=1e-6)

    # bf16 input stays on the native bf16 MXU path; one-hot gather is exact.
    xb = x.astype(jnp.bfloat16)
    outb = jax.block_until_ready(resize_forward(xb, down_scale=0.5))
    assert outb.dtype == jnp.bfloat16
    assert jnp.array_equal(outb, resize_reference(xb, 0.5))

    # Exercise the lane-dense tiled path (HW above the fused threshold, W % 128 == 0).
    y = jax.random.normal(jax.random.PRNGKey(1), (1, 3, 32, 128), dtype=jnp.float32)
    out_y = jax.block_until_ready(resize_forward(y, down_scale=0.5))
    assert jnp.allclose(out_y, resize_reference(y, 0.5), atol=1e-6, rtol=1e-6)

    # Module-style call, as in the original forward(image_cover_mask).
    out_m = jax.block_until_ready(Resize(0.5)([x, None, None]))
    assert jnp.allclose(out_m, ref, atol=1e-6, rtol=1e-6)

    print("KERNEL_OK")
</pallas_src>

<mosaic_0001>
module attributes {stable_mosaic.version = 11 : i64} {
  func.func @_resize_fused_kernel(%arg0: i32, %arg1: memref<256x256xf32, #tpu.memory_space<vmem>>, %arg2: memref<8x256xf32, #tpu.memory_space<vmem>>, %arg3: memref<8x256xf32, #tpu.memory_space<vmem>>) attributes {dimension_semantics = [#tpu.dimension_semantics<parallel>], iteration_bounds = array<i64: 1>, scalar_prefetch = 0 : i64, scratch_operands = 0 : i64, tpu.core_type = #tpu.core_type<tc>, window_params = [{pipeline_mode = #tpu.pipeline_mode<synchronous>, transform_indices = @transform_0, window_bounds = array<i64: 256, 256>}, {transform_indices = @transform_1, window_bounds = array<i64: 8, 256>}, {transform_indices = @transform_2, window_bounds = array<i64: 8, 256>}]} {
    %c0 = arith.constant 0 : index
    %c0_0 = arith.constant 0 : index
    %0 = vector.load %arg2[%c0, %c0_0] : memref<8x256xf32, #tpu.memory_space<vmem>>, vector<8x256xf32>
    %c0_1 = arith.constant 0 : index
    %c0_2 = arith.constant 0 : index
    %1 = vector.load %arg1[%c0_1, %c0_2] : memref<256x256xf32, #tpu.memory_space<vmem>>, vector<256x256xf32>
    %cst = arith.constant dense<0.000000e+00> : vector<8x256xf32>
    %2 = tpu.matmul %0, %1, %cst {dimension_numbers = #tpu.dot_dimension_numbers<[1], [0], [0], [1], [0, 0, 1, 1], [], []>} : vector<8x256xf32>, vector<256x256xf32>, vector<8x256xf32> -> vector<8x256xf32>
    %c0_3 = arith.constant 0 : index
    %c0_4 = arith.constant 0 : index
    %3 = vector.load %arg3[%c0_3, %c0_4] : memref<8x256xf32, #tpu.memory_space<vmem>>, vector<8x256xf32>
    tpu.vector_store %arg3[%c0_3, %c0_4], %2 {strides = array<i32>} : memref<8x256xf32, #tpu.memory_space<vmem>>, vector<8x256xf32>,
    return
  }
  func.func @transform_0(%arg0: i32) -> (i32, i32) {
    %c0_i32 = arith.constant 0 : i32
    %c0_i32_0 = arith.constant 0 : i32
    %c0_i32_1 = arith.constant 0 : i32
    return %c0_i32, %c0_i32_0 : i32, i32
  }
  func.func @transform_1(%arg0: i32) -> (i32, i32) {
    %c0_i32 = arith.constant 0 : i32
    %c0_i32_0 = arith.constant 0 : i32
    return %arg0, %c0_i32 : i32, i32
  }
  func.func @transform_2(%arg0: i32) -> (i32, i32) {
    %c0_i32 = arith.constant 0 : i32
    %c0_i32_0 = arith.constant 0 : i32
    return %arg0, %c0_i32 : i32, i32
  }
}

</mosaic_0001>

<bundles_post_ra>
// kernel: tpu_custom_call.1
= control target key start
LH: loop header
LB: loop body
LE: loop exit
PB: predicated region body
PF: predicated region fallthrough
CT: control target
= control target key end

     0   :  { %7 = vsyncpa [#allocation3], 0  ;;  %s293_s0 = inlined_call_operand.hbm [shape: f32[256,256], index: 0, kind: input, shape index: {}]   ;;  %s294_s1 = inlined_call_operand.hbm [shape: f32[8,256], index: 1, kind: input, shape index: {}]   ;;  %s295_s2 = inlined_call_operand.hbm [shape: f32[8,256], index: 2, kind: output, shape index: {}]  }
   0x1   :  { %8 = vsyncpa [#allocation6], 0 }
   0x2   :  { %9 = vsyncpa [#allocation4], 0  ;;  %s264_s9 = smov [#allocation2]  }
   0x3   :  { %s15_s10 = sshll.u32 %s264_s9, 4  ;;  %s16_s10 = int_to_ptr.vmem [resolvable:$true] %s15_s10 }
   0x4   :  { %s206_s11 = scalar_lea.vmem %s16_s10, 8192  ;;  %p211_p1 = scmp.lt.s32.totalorder %s16_s10, %s16_s10 }
   0x5   :  { %p207_p0 = scmp.ne.s32.totalorder %s16_s10, %s206_s11  ;;  %p212_p2 = scmp.lt.s32.totalorder %s206_s11, %s206_s11 }
   0x7   :  { %p213_p3 = por %p212_p2, %p211_p1 }
   0x9   :  { %p214_p4 = pnand %p213_p3, %p207_p0 }
   0xb   :  { %217 = shalt.err (!%p214_p4)
}
   0xc   :  { %s265_s12 = smov 256   ;;  %s266_s13 = smov 16  }
   0xd   :  { %21 = dma.hbm_to_vmem [thread:$0]  %s293_s0, 8192, %s16_s10, [#allocation3], %s265_s12, %s265_s12, %s266_s13  }
   0xe   :  { %s267_s16 = smov [#allocation5]  }
   0xf   :  { %s28_s17 = sshll.u32 %s267_s16, 4  ;;  %s29_s17 = int_to_ptr.vmem [resolvable:$true] %s28_s17 }
  0x10   :  { %s226_s18 = scalar_lea.vmem %s29_s17, 256  ;;  %p231_p6 = scmp.lt.s32.totalorder %s29_s17, %s29_s17 }
  0x11   :  { %p227_p5 = scmp.ne.s32.totalorder %s29_s17, %s226_s18  ;;  %p232_p7 = scmp.lt.s32.totalorder %s226_s18, %s226_s18 }
  0x13   :  { %p233_p8 = por %p232_p7, %p231_p6 }
  0x15   :  { %p234_p9 = pnand %p233_p8, %p227_p5 }
  0x17   :  { %237 = shalt.err (!%p234_p9)
}
  0x18   :  { %31 = dma.hbm_to_vmem [thread:$0]  %s294_s1, 256, %s29_s17, [#allocation6]  }
  0x19   :  { %258 = dma.done.wait [#allocation3], 8192  }
  0x1a   :  { %259 = vsyncadd [#allocation3], 4294959104 }
  0x1b   :  { %260 = dma.done.wait [#allocation6], 256  }
  0x1c   :  { %261 = vsyncadd [#allocation6], 4294967040  ;;  %v71_v0 = vld [vmem:[#allocation2 + $0xf8] sm:$0xff]  ;;  %v70_v1 = vld [vmem:[#allocation2 + $0xf0] sm:$0xff]  ;;  %s268_s0 = smov [#allocation7]  }
  0x1d   :  { %v69_v2 = vld [vmem:[#allocation2 + $0xe8] sm:$0xff]  ;;  %104 = vmatprep.subr.mxu0 %v71_v0  ;;  %v68_v3 = vld [vmem:[#allocation2 + $0xe0] sm:$0xff]  ;;  %v67_v4 = vld [vmem:[#allocation2 + $0xd8] sm:$0xff]  ;;  %s183_s1 = sshll.u32 %s268_s0, 4  ;;  %s184_s1 = int_to_ptr.vmem [resolvable:$true] %s183_s1 }
  0x1e   :  { %105 = vmatpush1.msra.mxu0 %v70_v1  ;;  %v66_v5 = vld [vmem:[#allocation2 + $0xd0] sm:$0xff]  ;;  %v65_v6 = vld [vmem:[#allocation2 + $0xc8] sm:$0xff]  ;;  %v64_v7 = vld [vmem:[#allocation2 + $0xc0] sm:$0xff]  ;;  %s238_s21 = scalar_lea.vmem %s184_s1, 256  ;;  %p243_p11 = scmp.lt.s32.totalorder %s184_s1, %s184_s1 }
  0x1f   :  { %106 = vmatprep.subr.mxu0 %v69_v2  ;;  %v63_v8 = vld [vmem:[#allocation2 + $0xb8] sm:$0xff]  ;;  %v62_v9 = vld [vmem:[#allocation2 + $0xb0] sm:$0xff]  ;;  %v61_v10 = vld [vmem:[#allocation2 + $0xa8] sm:$0xff]  ;;  %p239_p10 = scmp.ne.s32.totalorder %s184_s1, %s238_s21  ;;  %p244_p12 = scmp.lt.s32.totalorder %s238_s21, %s238_s21 }
  0x20   :  { %107 = vmatpush1.msra.mxu0 %v68_v3  ;;  %v60_v11 = vld [vmem:[#allocation2 + $0xa0] sm:$0xff]  ;;  %v59_v12 = vld [vmem:[#allocation2 + $0x98] sm:$0xff]  ;;  %v58_v13 = vld [vmem:[#allocation2 + $0x90] sm:$0xff] }
  0x21   :  { %108 = vmatprep.subr.mxu0 %v67_v4  ;;  %v57_v14 = vld [vmem:[#allocation2 + $0x88] sm:$0xff]  ;;  %v56_v15 = vld [vmem:[#allocation2 + $0x80] sm:$0xff]  ;;  %v55_v16 = vld [vmem:[#allocation2 + $0x78] sm:$0xff]  ;;  %p245_p13 = por %p244_p12, %p243_p11 }
  0x22   :  { %109 = vmatpush1.msra.mxu0 %v66_v5  ;;  %v54_v17 = vld [vmem:[#allocation2 + $0x70] sm:$0xff]  ;;  %v53_v18 = vld [vmem:[#allocation2 + $0x68] sm:$0xff]  ;;  %v52_v19 = vld [vmem:[#allocation2 + $0x60] sm:$0xff] }
  0x23   :  { %110 = vmatprep.subr.mxu0 %v65_v6  ;;  %v51_v20 = vld [vmem:[#allocation2 + $0x58] sm:$0xff]  ;;  %v50_v21 = vld [vmem:[#allocation2 + $0x50] sm:$0xff]  ;;  %v49_v22 = vld [vmem:[#allocation2 + $0x48] sm:$0xff]  ;;  %p246_p0 = pnand %p245_p13, %p239_p10 }
  0x24   :  { %111 = vmatpush1.msra.mxu0 %v64_v7  ;;  %v48_v23 = vld [vmem:[#allocation2 + $0x40] sm:$0xff]  ;;  %v39_v24 = vld [vmem:[#allocation5 + $0x8] sm:$0xff]  ;;  %v47_v25 = vld [vmem:[#allocation2 + $0x38] sm:$0xff] }
  0x25   :  { %112 = vmatprep.subr.mxu0 %v63_v8  ;;  %168 = vmatprep.mubr.f32.mxu0 %v39_v24  ;;  %v46_v26 = vld [vmem:[#allocation2 + $0x30] sm:$0xff]  ;;  %v45_v27 = vld [vmem:[#allocation2 + $0x28] sm:$0xff]  ;;  %v44_v28 = vld [vmem:[#allocation2 + $0x20] sm:$0xff] }
  0x26   :  { %113 = vmatpush1.msra.mxu0 %v62_v9  ;;  %v43_v29 = vld [vmem:[#allocation2 + $0x18] sm:$0xff]  ;;  %v42_v30 = vld [vmem:[#allocation2 + $0x10] sm:$0xff]  ;;  %v41_v31 = vld [vmem:[#allocation2 + $0x8] sm:$0xff] }
  0x27   :  { %114 = vmatprep.subr.mxu0 %v61_v10  ;;  %v40_v32 = vld [vmem:[#allocation2] sm:$0xff]  ;;  %v103_v33 = vld [vmem:[#allocation2 + $0x1f8] sm:$0xff]  ;;  %v102_v34 = vld [vmem:[#allocation2 + $0x1f0] sm:$0xff] }
  0x28   :  { %115 = vmatpush1.msra.mxu0 %v60_v11  ;;  %v101_v35 = vld [vmem:[#allocation2 + $0x1e8] sm:$0xff]  ;;  %v100_v36 = vld [vmem:[#allocation2 + $0x1e0] sm:$0xff]  ;;  %v99_v37 = vld [vmem:[#allocation2 + $0x1d8] sm:$0xff] }
  0x29   :  { %116 = vmatprep.subr.mxu0 %v59_v12  ;;  %v98_v38 = vld [vmem:[#allocation2 + $0x1d0] sm:$0xff]  ;;  %v97_v39 = vld [vmem:[#allocation2 + $0x1c8] sm:$0xff]  ;;  %v96_v40 = vld [vmem:[#allocation2 + $0x1c0] sm:$0xff] }
  0x2a   :  { %117 = vmatpush1.msra.mxu0 %v58_v13  ;;  %v95_v41 = vld [vmem:[#allocation2 + $0x1b8] sm:$0xff]  ;;  %v94_v42 = vld [vmem:[#allocation2 + $0x1b0] sm:$0xff]  ;;  %v93_v43 = vld [vmem:[#allocation2 + $0x1a8] sm:$0xff] }
  0x2b   :  { %118 = vmatprep.subr.mxu0 %v57_v14  ;;  %v92_v44 = vld [vmem:[#allocation2 + $0x1a0] sm:$0xff]  ;;  %v91_v45 = vld [vmem:[#allocation2 + $0x198] sm:$0xff]  ;;  %v90_v46 = vld [vmem:[#allocation2 + $0x190] sm:$0xff] }
  0x2c   :  { %119 = vmatpush1.msra.mxu0 %v56_v15  ;;  %v89_v47 = vld [vmem:[#allocation2 + $0x188] sm:$0xff]  ;;  %v88_v48 = vld [vmem:[#allocation2 + $0x180] sm:$0xff]  ;;  %v87_v49 = vld [vmem:[#allocation2 + $0x178] sm:$0xff] }
  0x2d   :  { %120 = vmatprep.subr.mxu0 %v55_v16  ;;  %v86_v50 = vld [vmem:[#allocation2 + $0x170] sm:$0xff]  ;;  %v85_v51 = vld [vmem:[#allocation2 + $0x168] sm:$0xff]  ;;  %v84_v52 = vld [vmem:[#allocation2 + $0x160] sm:$0xff] }
  0x2e   :  { %121 = vmatpush1.msra.mxu0 %v54_v17  ;;  %v83_v53 = vld [vmem:[#allocation2 + $0x158] sm:$0xff]  ;;  %v82_v54 = vld [vmem:[#allocation2 + $0x150] sm:$0xff]  ;;  %v81_v55 = vld [vmem:[#allocation2 + $0x148] sm:$0xff] }
  0x2f   :  { %122 = vmatprep.subr.mxu0 %v53_v18  ;;  %v80_v56 = vld [vmem:[#allocation2 + $0x140] sm:$0xff]  ;;  %v79_v57 = vld [vmem:[#allocation2 + $0x138] sm:$0xff]  ;;  %v78_v58 = vld [vmem:[#allocation2 + $0x130] sm:$0xff] }
  0x30   :  { %123 = vmatpush1.msra.mxu0 %v52_v19  ;;  %v77_v59 = vld [vmem:[#allocation2 + $0x128] sm:$0xff]  ;;  %v76_v60 = vld [vmem:[#allocation2 + $0x120] sm:$0xff]  ;;  %v75_v61 = vld [vmem:[#allocation2 + $0x118] sm:$0xff] }
  0x31   :  { %124 = vmatprep.subr.mxu0 %v51_v20  ;;  %v74_v62 = vld [vmem:[#allocation2 + $0x110] sm:$0xff]  ;;  %v73_v63 = vld [vmem:[#allocation2 + $0x108] sm:$0xff]  ;;  %v72_v0 = vld [vmem:[#allocation2 + $0x100] sm:$0xff] }
  0x32   :  { %125 = vmatpush1.msra.mxu0 %v50_v21  ;;  %v38_v1 = vld [vmem:[#allocation5] sm:$0xff] }
  0x33   :  { %126 = vmatprep.subr.mxu0 %v49_v22 }
  0x34   :  { %127 = vmatpush1.msra.mxu0 %v48_v23 }
  0x35   :  { %128 = vmatprep.subr.mxu0 %v47_v25 }
  0x36   :  { %129 = vmatpush1.msra.mxu0 %v46_v26 }
  0x37   :  { %130 = vmatprep.subr.mxu0 %v45_v27 }
  0x38   :  { %131 = vmatpush1.msra.mxu0 %v44_v28 }
  0x39   :  { %132 = vmatprep.subr.mxu0 %v43_v29 }
  0x3a   :  { %133 = vmatpush1.msra.mxu0 %v42_v30 }
  0x3b   :  { %134 = vmatprep.subr.mxu0 %v41_v31 }
  0x3c   :  { %135 = vmatpush1.msra.mxu0 %v40_v32 }
  0x3d   :  { %136 = vmatprep.subr.mxu0 %v103_v33 }
  0x3e   :  { %137 = vmatpush2.msra.mxu0 %v102_v34 }
  0x3f   :  { %138 = vmatprep.subr.mxu0 %v101_v35 }
  0x40   :  { %139 = vmatpush2.msra.mxu0 %v100_v36 }
  0x41   :  { %140 = vmatprep.subr.mxu0 %v99_v37 }
  0x42   :  { %141 = vmatpush2.msra.mxu0 %v98_v38 }
  0x43   :  { %142 = vmatprep.subr.mxu0 %v97_v39 }
  0x44   :  { %143 = vmatpush2.msra.mxu0 %v96_v40 }
  0x45   :  { %144 = vmatprep.subr.mxu0 %v95_v41 }
  0x46   :  { %145 = vmatpush2.msra.mxu0 %v94_v42 }
  0x47   :  { %146 = vmatprep.subr.mxu0 %v93_v43 }
  0x48   :  { %147 = vmatpush2.msra.mxu0 %v92_v44 }
  0x49   :  { %148 = vmatprep.subr.mxu0 %v91_v45 }
  0x4a   :  { %149 = vmatpush2.msra.mxu0 %v90_v46 }
  0x4b   :  { %150 = vmatprep.subr.mxu0 %v89_v47 }
  0x4c   :  { %151 = vmatpush2.msra.mxu0 %v88_v48 }
  0x4d   :  { %152 = vmatprep.subr.mxu0 %v87_v49 }
  0x4e   :  { %153 = vmatpush2.msra.mxu0 %v86_v50 }
  0x4f   :  { %154 = vmatprep.subr.mxu0 %v85_v51 }
  0x50   :  { %155 = vmatpush2.msra.mxu0 %v84_v52 }
  0x51   :  { %156 = vmatprep.subr.mxu0 %v83_v53 }
  0x52   :  { %157 = vmatpush2.msra.mxu0 %v82_v54 }
  0x53   :  { %158 = vmatprep.subr.mxu0 %v81_v55 }
  0x54   :  { %159 = vmatpush2.msra.mxu0 %v80_v56 }
  0x55   :  { %160 = vmatprep.subr.mxu0 %v79_v57 }
  0x56   :  { %161 = vmatpush2.msra.mxu0 %v78_v58 }
  0x57   :  { %162 = vmatprep.subr.mxu0 %v77_v59 }
  0x58   :  { %163 = vmatpush2.msra.mxu0 %v76_v60 }
  0x59   :  { %164 = vmatprep.subr.mxu0 %v75_v61 }
  0x5a   :  { %165 = vmatpush2.msra.mxu0 %v74_v62 }
  0x5b   :  { %166 = vmatprep.subr.mxu0 %v73_v63 }
  0x5c   :  { %167 = vmatpush2.msra.mxu0 %v72_v0 }
  0x5d   :  { %169 = vmatmul.mubr.f32.vlgmr.msra.gmra.mxu0 %v38_v1 }
 0x11d   :  { %v170_v2 = vpop.f32.mrf.mxu0 }
 0x11e   :  { %175 = vst [vmem:[#allocation7] sm:$0xff] %v170_v2 }
 0x11f   :  { %v172_v3 = vpop.f32.mrf.mxu0 }
 0x120   :  { %176 = vst [vmem:[#allocation7 + $0x8] sm:$0xff] %v172_v3 }
 0x121   :  { %249 = shalt.err (!%p246_p0)
}
 0x122   :  { %186 = dma.vmem_to_hbm [thread:$0]  %s184_s1, 256, %s295_s2, [#allocation4]  }
 0x123   :  { %262 = dma.done.wait [#allocation4], 256  }
 0x124   :  { %263 = vsyncadd [#allocation4], 4294967040 }
 0x125   :  { %190 = vsyncpa [#allocation3], 1 }
 0x126   :  { %191 = vsyncpa [#allocation6], 1 }
 0x127   :  { %192 = vsyncpa [#allocation4], 1 }

</bundles_post_ra>
